<compile_context>
chip_gen: v6e
topology: v6e:2x2x1
jax: 0.10.0
libtpu: 0.0.40
codegen_flags: <defaults>
</compile_context>

<pallas_src>
import jax
import jax.numpy as jnp
from jax.experimental import pallas as pl
from jax.experimental.pallas import tpu as pltpu

D_IN, D_H1, D_H2, D_OUT = 784, 128, 64, 10
D_OUT_PAD = 128          # lane-dense padded head width (multiple of 128)
LN_EPS = 1e-5


def _round_up(n, m):
    return ((n + m - 1) // m) * m


def _layernorm_1pass(h, gamma, beta, d):
    # One pass over h: E[x] and E[x^2]; var = E[x^2] - E[x]^2 (biased, matches PyTorch LN).
    inv_d = 1.0 / d
    mu = jnp.sum(h, axis=-1, keepdims=True) * inv_d
    ex2 = jnp.sum(h * h, axis=-1, keepdims=True) * inv_d
    var = ex2 - mu * mu
    return (h - mu) * jax.lax.rsqrt(var + LN_EPS) * gamma + beta


def mlp_ln_kernel(x_ref,
                  w1_ref, b1_ref, g1_ref, be1_ref,
                  w2_ref, b2_ref, g2_ref, be2_ref,
                  w3_ref, b3_ref,
                  o_ref):
    x = x_ref[...].astype(jnp.float32)                       # (bt, 784) f32 compute

    # block1: Linear(784,128) -> LayerNorm(128) -> ReLU
    h1 = jnp.dot(x, w1_ref[...], preferred_element_type=jnp.float32) + b1_ref[...]
    h1 = _layernorm_1pass(h1, g1_ref[...], be1_ref[...], D_H1)
    h1 = jnp.maximum(h1, 0.0)

    # block2: Linear(128,64) -> LayerNorm(64) -> ReLU
    h2 = jnp.dot(h1, w2_ref[...], preferred_element_type=jnp.float32) + b2_ref[...]
    h2 = _layernorm_1pass(h2, g2_ref[...], be2_ref[...], D_H2)
    h2 = jnp.maximum(h2, 0.0)

    # head: Linear(64,128-padded); real logits live in lanes [:10]
    out = jnp.dot(h2, w3_ref[...], preferred_element_type=jnp.float32) + b3_ref[...]
    o_ref[...] = out.astype(o_ref.dtype)


def model_layernorm_forward(x, params, *, batch_tile=512, x_dtype=None):
    """x: (B, 1, 28, 28) or (B, 784) -> (B, 10) float32.

    batch_tile: rows per grid step (512-1024 recommended; clamped for tiny batches).
    x_dtype:    optionally jnp.bfloat16 to halve the dominant HBM byte stream.
    """
    x2d = x.reshape(-1, D_IN)
    if x_dtype is not None:
        x2d = x2d.astype(x_dtype)
    B = x2d.shape[0]

    # Sublane-aligned tile (8 rows for f32, 16 for bf16), clamped for small batches,
    # then zero-pad the batch so the grid divides evenly (padded rows discarded below).
    row_align = 16 if x2d.dtype == jnp.bfloat16 else 8
    bt = max(row_align, min(batch_tile, _round_up(B, row_align)))
    bt = _round_up(bt, row_align)
    B_pad = _round_up(B, bt)
    if B_pad != B:
        x2d = jnp.pad(x2d, ((0, B_pad - B), (0, 0)))

    (w1, b1, g1, be1, w2, b2, g2, be2, w3, b3) = params

    # Lane-dense head: pad (64,10)->(64,128), (1,10)->(1,128). Only the head output is
    # padded; dimensions that LayerNorm reduces over are never padded.
    w3p = jnp.pad(w3, ((0, 0), (0, D_OUT_PAD - D_OUT)))
    b3p = jnp.pad(b3, ((0, 0), (0, D_OUT_PAD - D_OUT)))

    grid = (B_pad // bt,)

    def param_spec(shape):
        # Full-array block, same block index every grid step -> stays resident in VMEM.
        return pl.BlockSpec(shape, lambda i: (0, 0))

    x_item = x2d.dtype.itemsize
    param_bytes = sum(int(p.size) * p.dtype.itemsize
                      for p in (w1, b1, g1, be1, w2, b2, g2, be2, w3p, b3p))
    # double-buffered x tile + double-buffered output tile + params + live f32 temps
    vmem_bytes = (2 * bt * D_IN * x_item
                  + 2 * bt * D_OUT_PAD * 4
                  + 2 * param_bytes
                  + bt * (D_IN + D_H1 + D_H2 + D_OUT_PAD) * 4
                  + (4 << 20))                       # headroom
    vmem_bytes = int(min(max(vmem_bytes, 16 << 20), 48 << 20))  # safe on v5e/v6e/v7x

    flops = 2 * B_pad * (D_IN * D_H1 + D_H1 * D_H2 + D_H2 * D_OUT_PAD)
    bytes_accessed = B_pad * D_IN * x_item + param_bytes + B_pad * D_OUT_PAD * 4

    out = pl.pallas_call(
        mlp_ln_kernel,
        out_shape=jax.ShapeDtypeStruct((B_pad, D_OUT_PAD), jnp.float32),
        grid_spec=pltpu.PrefetchScalarGridSpec(
            num_scalar_prefetch=0,
            grid=grid,
            in_specs=[
                pl.BlockSpec((bt, D_IN), lambda i: (i, 0)),
                param_spec((D_IN, D_H1)), param_spec((1, D_H1)),
                param_spec((1, D_H1)), param_spec((1, D_H1)),
                param_spec((D_H1, D_H2)), param_spec((1, D_H2)),
                param_spec((1, D_H2)), param_spec((1, D_H2)),
                param_spec((D_H2, D_OUT_PAD)), param_spec((1, D_OUT_PAD)),
            ],
            out_specs=pl.BlockSpec((bt, D_OUT_PAD), lambda i: (i, 0)),
        ),
        compiler_params=pltpu.CompilerParams(
            dimension_semantics=("parallel",),
            vmem_limit_bytes=vmem_bytes),
        cost_estimate=pl.CostEstimate(
            flops=int(flops),
            transcendentals=int(2 * B_pad),           # 2 rsqrt per row
            bytes_accessed=int(bytes_accessed)),
    )(x2d, w1, b1, g1, be1, w2, b2, g2, be2, w3p, b3p)

    return out[:B, :D_OUT]


def init_params(key):
    """Deterministic synthetic parameters matching the module's shapes.

    Linear weights stored pre-transposed as (in, out); biases / LN params as (1, out)."""
    ks = jax.random.split(key, 7)

    def lin(k, d_in, d_out):
        scale = 1.0 / jnp.sqrt(d_in)
        w = jax.random.uniform(k, (d_in, d_out), jnp.float32, -scale, scale)
        kb = jax.random.fold_in(k, 1)
        b = jax.random.uniform(kb, (1, d_out), jnp.float32, -scale, scale)
        return w, b

    w1, b1 = lin(ks[0], D_IN, D_H1)
    w2, b2 = lin(ks[1], D_H1, D_H2)
    w3, b3 = lin(ks[2], D_H2, D_OUT)
    # LayerNorm affine params (non-trivial values to exercise the affine path).
    g1 = 1.0 + 0.1 * jax.random.normal(ks[3], (1, D_H1), jnp.float32)
    be1 = 0.1 * jax.random.normal(ks[4], (1, D_H1), jnp.float32)
    g2 = 1.0 + 0.1 * jax.random.normal(ks[5], (1, D_H2), jnp.float32)
    be2 = 0.1 * jax.random.normal(ks[6], (1, D_H2), jnp.float32)
    return (w1, b1, g1, be1, w2, b2, g2, be2, w3, b3)


def reference_forward(x, params):
    (w1, b1, g1, be1, w2, b2, g2, be2, w3, b3) = params

    def ln(h, gamma, beta):
        mu = jnp.mean(h, axis=-1, keepdims=True)
        var = jnp.mean(jnp.square(h - mu), axis=-1, keepdims=True)
        return (h - mu) * jax.lax.rsqrt(var + LN_EPS) * gamma + beta

    x = x.reshape(-1, D_IN)
    h = jnp.maximum(ln(x @ w1 + b1, g1, be1), 0.0)
    h = jnp.maximum(ln(h @ w2 + b2, g2, be2), 0.0)
    return h @ w3 + b3


if __name__ == "__main__":
    key = jax.random.PRNGKey(0)
    kx, kp = jax.random.split(key)
    params = init_params(kp)

    # Small MNIST-like batch: (batch=8, 1, 28, 28)
    x = jax.random.normal(kx, (8, 1, 28, 28), jnp.float32)
    out = jax.block_until_ready(model_layernorm_forward(x, params))
    ref = reference_forward(x, params)
    assert out.shape == (8, D_OUT)
    assert jnp.allclose(out, ref, atol=1e-3, rtol=1e-3), "mismatch vs JAX reference (B=8)"

    # Also exercise padding + lane-dense padded head with a batch that is not
    # sublane-aligned (B=300, default batch_tile=512 -> clamped single-step grid).
    xb = jax.random.normal(jax.random.fold_in(kx, 1), (300, 1, 28, 28), jnp.float32)
    outb = jax.block_until_ready(model_layernorm_forward(xb, params))
    refb = reference_forward(xb, params)
    assert outb.shape == (300, D_OUT)
    assert jnp.allclose(outb, refb, atol=1e-3, rtol=1e-3), "mismatch vs JAX reference (B=300)"

    print("KERNEL_OK")
</pallas_src>

<mosaic_0001>
module attributes {stable_mosaic.version = 11 : i64} {
  func.func @mlp_ln_kernel(%arg0: i32, %arg1: memref<8x784xf32, #tpu.memory_space<vmem>>, %arg2: memref<784x128xf32, #tpu.memory_space<vmem>>, %arg3: memref<1x128xf32, #tpu.memory_space<vmem>>, %arg4: memref<1x128xf32, #tpu.memory_space<vmem>>, %arg5: memref<1x128xf32, #tpu.memory_space<vmem>>, %arg6: memref<128x64xf32, #tpu.memory_space<vmem>>, %arg7: memref<1x64xf32, #tpu.memory_space<vmem>>, %arg8: memref<1x64xf32, #tpu.memory_space<vmem>>, %arg9: memref<1x64xf32, #tpu.memory_space<vmem>>, %arg10: memref<64x128xf32, #tpu.memory_space<vmem>>, %arg11: memref<1x128xf32, #tpu.memory_space<vmem>>, %arg12: memref<8x128xf32, #tpu.memory_space<vmem>>) attributes {dimension_semantics = [#tpu.dimension_semantics<parallel>], iteration_bounds = array<i64: 1>, scalar_prefetch = 0 : i64, scratch_operands = 0 : i64, tpu.core_type = #tpu.core_type<tc>, window_params = [{transform_indices = @transform_0, window_bounds = array<i64: 8, 784>}, {pipeline_mode = #tpu.pipeline_mode<synchronous>, transform_indices = @transform_1, window_bounds = array<i64: 784, 128>}, {pipeline_mode = #tpu.pipeline_mode<synchronous>, transform_indices = @transform_2, window_bounds = array<i64: 1, 128>}, {pipeline_mode = #tpu.pipeline_mode<synchronous>, transform_indices = @transform_3, window_bounds = array<i64: 1, 128>}, {pipeline_mode = #tpu.pipeline_mode<synchronous>, transform_indices = @transform_4, window_bounds = array<i64: 1, 128>}, {pipeline_mode = #tpu.pipeline_mode<synchronous>, transform_indices = @transform_5, window_bounds = array<i64: 128, 64>}, {pipeline_mode = #tpu.pipeline_mode<synchronous>, transform_indices = @transform_6, window_bounds = array<i64: 1, 64>}, {pipeline_mode = #tpu.pipeline_mode<synchronous>, transform_indices = @transform_7, window_bounds = array<i64: 1, 64>}, {pipeline_mode = #tpu.pipeline_mode<synchronous>, transform_indices = @transform_8, window_bounds = array<i64: 1, 64>}, {pipeline_mode = #tpu.pipeline_mode<synchronous>, transform_indices = @transform_9, window_bounds = array<i64: 64, 128>}, {pipeline_mode = #tpu.pipeline_mode<synchronous>, transform_indices = @transform_10, window_bounds = array<i64: 1, 128>}, {transform_indices = @transform_11, window_bounds = array<i64: 8, 128>}]} {
    %c0 = arith.constant 0 : index
    %c0_0 = arith.constant 0 : index
    %0 = vector.load %arg1[%c0, %c0_0] : memref<8x784xf32, #tpu.memory_space<vmem>>, vector<8x784xf32>
    %c0_1 = arith.constant 0 : index
    %c0_2 = arith.constant 0 : index
    %1 = vector.load %arg2[%c0_1, %c0_2] : memref<784x128xf32, #tpu.memory_space<vmem>>, vector<784x128xf32>
    %cst = arith.constant dense<0.000000e+00> : vector<8x128xf32>
    %2 = tpu.matmul %0, %1, %cst {dimension_numbers = #tpu.dot_dimension_numbers<[1], [0], [0], [1], [0, 0, 1, 1], [], []>} : vector<8x784xf32>, vector<784x128xf32>, vector<8x128xf32> -> vector<8x128xf32>
    %c0_3 = arith.constant 0 : index
    %c0_4 = arith.constant 0 : index
    %3 = vector.load %arg3[%c0_3, %c0_4] : memref<1x128xf32, #tpu.memory_space<vmem>>, vector<1x128xf32>
    %4 = vector.broadcast %3 : vector<1x128xf32> to vector<8x128xf32>
    %5 = arith.addf %2, %4 : vector<8x128xf32>
    %c0_5 = arith.constant 0 : index
    %c0_6 = arith.constant 0 : index
    %6 = vector.load %arg4[%c0_5, %c0_6] : memref<1x128xf32, #tpu.memory_space<vmem>>, vector<1x128xf32>
    %c0_7 = arith.constant 0 : index
    %c0_8 = arith.constant 0 : index
    %7 = vector.load %arg5[%c0_7, %c0_8] : memref<1x128xf32, #tpu.memory_space<vmem>>, vector<1x128xf32>
    %cst_9 = arith.constant dense<0.000000e+00> : vector<8xf32>
    %8 = vector.multi_reduction <add>, %5, %cst_9 [1] : vector<8x128xf32> to vector<8xf32>
    %9 = vector.shape_cast %8 : vector<8xf32> to vector<8x1xf32>
    %cst_10 = arith.constant 7.812500e-03 : f32
    %10 = vector.broadcast %cst_10 : f32 to vector<8x1xf32>
    %11 = arith.mulf %9, %10 : vector<8x1xf32>
    %12 = arith.mulf %5, %5 : vector<8x128xf32>
    %cst_11 = arith.constant dense<0.000000e+00> : vector<8xf32>
    %13 = vector.multi_reduction <add>, %12, %cst_11 [1] : vector<8x128xf32> to vector<8xf32>
    %14 = vector.shape_cast %13 : vector<8xf32> to vector<8x1xf32>
    %cst_12 = arith.constant 7.812500e-03 : f32
    %15 = vector.broadcast %cst_12 : f32 to vector<8x1xf32>
    %16 = arith.mulf %14, %15 : vector<8x1xf32>
    %17 = arith.mulf %11, %11 : vector<8x1xf32>
    %18 = arith.subf %16, %17 : vector<8x1xf32>
    %19 = vector.broadcast %11 : vector<8x1xf32> to vector<8x128xf32>
    %20 = arith.subf %5, %19 : vector<8x128xf32>
    %cst_13 = arith.constant 9.99999974E-6 : f32
    %21 = vector.broadcast %cst_13 : f32 to vector<8x1xf32>
    %22 = arith.addf %18, %21 : vector<8x1xf32>
    %23 = math.rsqrt %22 : vector<8x1xf32>
    %24 = vector.broadcast %23 : vector<8x1xf32> to vector<8x128xf32>
    %25 = arith.mulf %20, %24 : vector<8x128xf32>
    %26 = vector.broadcast %6 : vector<1x128xf32> to vector<8x128xf32>
    %27 = arith.mulf %25, %26 : vector<8x128xf32>
    %28 = vector.broadcast %7 : vector<1x128xf32> to vector<8x128xf32>
    %29 = arith.addf %27, %28 : vector<8x128xf32>
    %cst_14 = arith.constant 0.000000e+00 : f32
    %30 = vector.broadcast %cst_14 : f32 to vector<8x128xf32>
    %31 = arith.maximumf %29, %30 : vector<8x128xf32>
    %c0_15 = arith.constant 0 : index
    %c0_16 = arith.constant 0 : index
    %32 = vector.load %arg6[%c0_15, %c0_16] : memref<128x64xf32, #tpu.memory_space<vmem>>, vector<128x64xf32>
    %cst_17 = arith.constant dense<0.000000e+00> : vector<8x64xf32>
    %33 = tpu.matmul %31, %32, %cst_17 {dimension_numbers = #tpu.dot_dimension_numbers<[1], [0], [0], [1], [0, 0, 1, 1], [], []>} : vector<8x128xf32>, vector<128x64xf32>, vector<8x64xf32> -> vector<8x64xf32>
    %c0_18 = arith.constant 0 : index
    %c0_19 = arith.constant 0 : index
    %34 = vector.load %arg7[%c0_18, %c0_19] : memref<1x64xf32, #tpu.memory_space<vmem>>, vector<1x64xf32>
    %35 = vector.broadcast %34 : vector<1x64xf32> to vector<8x64xf32>
    %36 = arith.addf %33, %35 : vector<8x64xf32>
    %c0_20 = arith.constant 0 : index
    %c0_21 = arith.constant 0 : index
    %37 = vector.load %arg8[%c0_20, %c0_21] : memref<1x64xf32, #tpu.memory_space<vmem>>, vector<1x64xf32>
    %c0_22 = arith.constant 0 : index
    %c0_23 = arith.constant 0 : index
    %38 = vector.load %arg9[%c0_22, %c0_23] : memref<1x64xf32, #tpu.memory_space<vmem>>, vector<1x64xf32>
    %cst_24 = arith.constant dense<0.000000e+00> : vector<8xf32>
    %39 = vector.multi_reduction <add>, %36, %cst_24 [1] : vector<8x64xf32> to vector<8xf32>
    %40 = vector.shape_cast %39 : vector<8xf32> to vector<8x1xf32>
    %cst_25 = arith.constant 1.562500e-02 : f32
    %41 = vector.broadcast %cst_25 : f32 to vector<8x1xf32>
    %42 = arith.mulf %40, %41 : vector<8x1xf32>
    %43 = arith.mulf %36, %36 : vector<8x64xf32>
    %cst_26 = arith.constant dense<0.000000e+00> : vector<8xf32>
    %44 = vector.multi_reduction <add>, %43, %cst_26 [1] : vector<8x64xf32> to vector<8xf32>
    %45 = vector.shape_cast %44 : vector<8xf32> to vector<8x1xf32>
    %cst_27 = arith.constant 1.562500e-02 : f32
    %46 = vector.broadcast %cst_27 : f32 to vector<8x1xf32>
    %47 = arith.mulf %45, %46 : vector<8x1xf32>
    %48 = arith.mulf %42, %42 : vector<8x1xf32>
    %49 = arith.subf %47, %48 : vector<8x1xf32>
    %50 = vector.broadcast %42 : vector<8x1xf32> to vector<8x64xf32>
    %51 = arith.subf %36, %50 : vector<8x64xf32>
    %cst_28 = arith.constant 9.99999974E-6 : f32
    %52 = vector.broadcast %cst_28 : f32 to vector<8x1xf32>
    %53 = arith.addf %49, %52 : vector<8x1xf32>
    %54 = math.rsqrt %53 : vector<8x1xf32>
    %55 = vector.broadcast %54 : vector<8x1xf32> to vector<8x64xf32>
    %56 = arith.mulf %51, %55 : vector<8x64xf32>
    %57 = vector.broadcast %37 : vector<1x64xf32> to vector<8x64xf32>
    %58 = arith.mulf %56, %57 : vector<8x64xf32>
    %59 = vector.broadcast %38 : vector<1x64xf32> to vector<8x64xf32>
    %60 = arith.addf %58, %59 : vector<8x64xf32>
    %cst_29 = arith.constant 0.000000e+00 : f32
    %61 = vector.broadcast %cst_29 : f32 to vector<8x64xf32>
    %62 = arith.maximumf %60, %61 : vector<8x64xf32>
    %c0_30 = arith.constant 0 : index
    %c0_31 = arith.constant 0 : index
    %63 = vector.load %arg10[%c0_30, %c0_31] : memref<64x128xf32, #tpu.memory_space<vmem>>, vector<64x128xf32>
    %cst_32 = arith.constant dense<0.000000e+00> : vector<8x128xf32>
    %64 = tpu.matmul %62, %63, %cst_32 {dimension_numbers = #tpu.dot_dimension_numbers<[1], [0], [0], [1], [0, 0, 1, 1], [], []>} : vector<8x64xf32>, vector<64x128xf32>, vector<8x128xf32> -> vector<8x128xf32>
    %c0_33 = arith.constant 0 : index
    %c0_34 = arith.constant 0 : index
    %65 = vector.load %arg11[%c0_33, %c0_34] : memref<1x128xf32, #tpu.memory_space<vmem>>, vector<1x128xf32>
    %66 = vector.broadcast %65 : vector<1x128xf32> to vector<8x128xf32>
    %67 = arith.addf %64, %66 : vector<8x128xf32>
    %c0_35 = arith.constant 0 : index
    %c0_36 = arith.constant 0 : index
    %68 = vector.load %arg12[%c0_35, %c0_36] : memref<8x128xf32, #tpu.memory_space<vmem>>, vector<8x128xf32>
    tpu.vector_store %arg12[%c0_35, %c0_36], %67 {strides = array<i32>} : memref<8x128xf32, #tpu.memory_space<vmem>>, vector<8x128xf32>,
    return
  }
  func.func @transform_0(%arg0: i32) -> (i32, i32) {
    %c0_i32 = arith.constant 0 : i32
    %c0_i32_0 = arith.constant 0 : i32
    return %arg0, %c0_i32 : i32, i32
  }
  func.func @transform_1(%arg0: i32) -> (i32, i32) {
    %c0_i32 = arith.constant 0 : i32
    %c0_i32_0 = arith.constant 0 : i32
    %c0_i32_1 = arith.constant 0 : i32
    return %c0_i32, %c0_i32_0 : i32, i32
  }
  func.func @transform_2(%arg0: i32) -> (i32, i32) {
    %c0_i32 = arith.constant 0 : i32
    %c0_i32_0 = arith.constant 0 : i32
    %c0_i32_1 = arith.constant 0 : i32
    return %c0_i32, %c0_i32_0 : i32, i32
  }
  func.func @transform_3(%arg0: i32) -> (i32, i32) {
    %c0_i32 = arith.constant 0 : i32
    %c0_i32_0 = arith.constant 0 : i32
    %c0_i32_1 = arith.constant 0 : i32
    return %c0_i32, %c0_i32_0 : i32, i32
  }
  func.func @transform_4(%arg0: i32) -> (i32, i32) {
    %c0_i32 = arith.constant 0 : i32
    %c0_i32_0 = arith.constant 0 : i32
    %c0_i32_1 = arith.constant 0 : i32
    return %c0_i32, %c0_i32_0 : i32, i32
  }
  func.func @transform_5(%arg0: i32) -> (i32, i32) {
    %c0_i32 = arith.constant 0 : i32
    %c0_i32_0 = arith.constant 0 : i32
    %c0_i32_1 = arith.constant 0 : i32
    return %c0_i32, %c0_i32_0 : i32, i32
  }
  func.func @transform_6(%arg0: i32) -> (i32, i32) {
    %c0_i32 = arith.constant 0 : i32
    %c0_i32_0 = arith.constant 0 : i32
    %c0_i32_1 = arith.constant 0 : i32
    return %c0_i32, %c0_i32_0 : i32, i32
  }
  func.func @transform_7(%arg0: i32) -> (i32, i32) {
    %c0_i32 = arith.constant 0 : i32
    %c0_i32_0 = arith.constant 0 : i32
    %c0_i32_1 = arith.constant 0 : i32
    return %c0_i32, %c0_i32_0 : i32, i32
  }
  func.func @transform_8(%arg0: i32) -> (i32, i32) {
    %c0_i32 = arith.constant 0 : i32
    %c0_i32_0 = arith.constant 0 : i32
    %c0_i32_1 = arith.constant 0 : i32
    return %c0_i32, %c0_i32_0 : i32, i32
  }
  func.func @transform_9(%arg0: i32) -> (i32, i32) {
    %c0_i32 = arith.constant 0 : i32
    %c0_i32_0 = arith.constant 0 : i32
    %c0_i32_1 = arith.constant 0 : i32
    return %c0_i32, %c0_i32_0 : i32, i32
  }
  func.func @transform_10(%arg0: i32) -> (i32, i32) {
    %c0_i32 = arith.constant 0 : i32
    %c0_i32_0 = arith.constant 0 : i32
    %c0_i32_1 = arith.constant 0 : i32
    return %c0_i32, %c0_i32_0 : i32, i32
  }
  func.func @transform_11(%arg0: i32) -> (i32, i32) {
    %c0_i32 = arith.constant 0 : i32
    %c0_i32_0 = arith.constant 0 : i32
    return %arg0, %c0_i32 : i32, i32
  }
}

</mosaic_0001>

<bundles_post_ra>
// kernel: tpu_custom_call.1
= control target key start
LH: loop header
LB: loop body
LE: loop exit
PB: predicated region body
PF: predicated region fallthrough
CT: control target
= control target key end

     0   :  { %16 = vsyncpa [#allocation3], 0  ;;  %s1194_s0 = inlined_call_operand.vmem [shape: f32[8,784], index: 0, kind: input, shape index: {}]   ;;  %s1195_s1 = inlined_call_operand.hbm [shape: f32[784,128], index: 1, kind: input, shape index: {}]   ;;  %s1196_s2 = inlined_call_operand.vmem [shape: f32[1,128], index: 2, kind: input, shape index: {}]   ;;  %s1197_s3 = inlined_call_operand.vmem [shape: f32[1,128], index: 3, kind: input, shape index: {}]   ;;  %s1198_s4 = inlined_call_operand.vmem [shape: f32[1,128], index: 4, kind: input, shape index: {}]   ;;  %s1199_s5 = inlined_call_operand.vmem [shape: f32[128,64], index: 5, kind: input, shape index: {}]   ;;  %s1200_s6 = inlined_call_operand.vmem [shape: f32[1,64], index: 6, kind: input, shape index: {}]   ;;  %s1201_s7 = inlined_call_operand.vmem [shape: f32[1,64], index: 7, kind: input, shape index: {}]   ;;  %s1202_s8 = inlined_call_operand.vmem [shape: f32[1,64], index: 8, kind: input, shape index: {}]   ;;  %s1203_s9 = inlined_call_operand.vmem [shape: f32[64,128], index: 9, kind: input, shape index: {}]   ;;  %s1204_s10 = inlined_call_operand.vmem [shape: f32[1,128], index: 10, kind: input, shape index: {}]   ;;  %s1205_s11 = inlined_call_operand.hbm [shape: f32[8,128], index: 11, kind: output, shape index: {}]  }
   0x1   :  { %17 = vsyncpa [#allocation4], 0  ;;  %s967_s17 = smov [#allocation2]  }
   0x2   :  { %s25_s18 = sshll.u32 %s967_s17, 4  ;;  %s26_s18 = int_to_ptr.vmem [resolvable:$true] %s25_s18 }
   0x3   :  { %s931_s19 = scalar_lea.vmem %s26_s18, 12544  ;;  %p936_p1 = scmp.lt.s32.totalorder %s26_s18, %s26_s18 }
   0x4   :  { %p932_p0 = scmp.ne.s32.totalorder %s26_s18, %s931_s19  ;;  %p937_p2 = scmp.lt.s32.totalorder %s931_s19, %s931_s19 }
   0x6   :  { %p938_p3 = por %p937_p2, %p936_p1 }
   0x8   :  { %p939_p4 = pnand %p938_p3, %p932_p0 }
   0xa   :  { %942 = shalt.err (!%p939_p4)
}
   0xb   :  { %s968_s20 = smov 128   ;;  %s969_s21 = smov 8  }
   0xc   :  { %31 = dma.hbm_to_vmem [thread:$0]  %s1195_s1, 12544, %s26_s18, [#allocation3], %s968_s20, %s968_s20, %s969_s21  }
   0xd   :  { %963 = dma.done.wait [#allocation3], 12544  }
   0xe   :  { %964 = vsyncadd [#allocation3], 4294954752  ;;  %v91_v0 = vld [vmem:[#allocation2 + $0xf8] sm:$0xff]  ;;  %v90_v2 = vld [vmem:[#allocation2 + $0xf0] sm:$0xff]  ;;  %vm165_vm0 = vcmask 130048   ;;  %vm971_vm1 = vmmov 0  }
   0xf   :  { %v75_v1 = vld [vmem:[#allocation2 + $0x78] sm:$0xff]  ;;  %718 = vmatprep.subr.mxu0 %v91_v0  ;;  %v74_v4 = vld [vmem:[#allocation2 + $0x70] sm:$0xff]  ;;  %v89_v6 = vld [vmem:[#allocation2 + $0xe8] sm:$0xff]  ;;  %vm574_vm2 = vcmask 523264   ;;  %s972_s28 = smov [#allocation5]  }
  0x10   :  { %v123_v3 = vld [vmem:[#allocation2 + $0x1f8] sm:$0xff]  ;;  %719 = vmatpush3.msra.mxu0 %v75_v1  ;;  %v122_v7 = vld [vmem:[#allocation2 + $0x1f0] sm:$0xff]  ;;  %v73_v8 = vld [vmem:[#allocation2 + $0x68] sm:$0xff] }
  0x11   :  { %v107_v5 = vld [vmem:[#allocation2 + $0x178] sm:$0xff]  ;;  %753 = vmatprep.subr.mxu1 %v123_v3  ;;  %720 = vmatprep.subr.mxu0 %v90_v2  ;;  %v106_v9 = vld [vmem:[#allocation2 + $0x170] sm:$0xff]  ;;  %v121_v10 = vld [vmem:[#allocation2 + $0x1e8] sm:$0xff] }
  0x12   :  { %754 = vmatpush3.msra.mxu1 %v107_v5  ;;  %721 = vmatpush3.msra.mxu0 %v74_v4  ;;  %v88_v11 = vld [vmem:[#allocation2 + $0xe0] sm:$0xff]  ;;  %v105_v12 = vld [vmem:[#allocation2 + $0x168] sm:$0xff]  ;;  %v87_v15 = vld [vmem:[#allocation2 + $0xd8] sm:$0xff] }
  0x13   :  { %755 = vmatprep.subr.mxu1 %v122_v7  ;;  %722 = vmatprep.subr.mxu0 %v89_v6  ;;  %v72_v13 = vld [vmem:[#allocation2 + $0x60] sm:$0xff]  ;;  %v71_v17 = vld [vmem:[#allocation2 + $0x58] sm:$0xff]  ;;  %v86_v19 = vld [vmem:[#allocation2 + $0xd0] sm:$0xff] }
  0x14   :  { %756 = vmatpush3.msra.mxu1 %v106_v9  ;;  %v120_v14 = vld [vmem:[#allocation2 + $0x1e0] sm:$0xff]  ;;  %723 = vmatpush3.msra.mxu0 %v73_v8  ;;  %v119_v18 = vld [vmem:[#allocation2 + $0x1d8] sm:$0xff]  ;;  %v70_v21 = vld [vmem:[#allocation2 + $0x50] sm:$0xff] }
  0x15   :  { %757 = vmatprep.subr.mxu1 %v121_v10  ;;  %v104_v16 = vld [vmem:[#allocation2 + $0x160] sm:$0xff]  ;;  %724 = vmatprep.subr.mxu0 %v88_v11  ;;  %v103_v20 = vld [vmem:[#allocation2 + $0x158] sm:$0xff]  ;;  %v118_v22 = vld [vmem:[#allocation2 + $0x1d0] sm:$0xff] }
  0x16   :  { %758 = vmatpush3.msra.mxu1 %v105_v12  ;;  %725 = vmatpush3.msra.mxu0 %v72_v13  ;;  %v85_v23 = vld [vmem:[#allocation2 + $0xc8] sm:$0xff]  ;;  %v102_v24 = vld [vmem:[#allocation2 + $0x150] sm:$0xff]  ;;  %v84_v27 = vld [vmem:[#allocation2 + $0xc0] sm:$0xff] }
  0x17   :  { %759 = vmatprep.subr.mxu1 %v120_v14  ;;  %726 = vmatprep.subr.mxu0 %v87_v15  ;;  %v69_v25 = vld [vmem:[#allocation2 + $0x48] sm:$0xff]  ;;  %v68_v29 = vld [vmem:[#allocation2 + $0x40] sm:$0xff]  ;;  %v83_v31 = vld [vmem:[#allocation2 + $0xb8] sm:$0xff]  ;;  %v970_v14 = vmov 0.0  }
  0x18   :  { %760 = vmatpush3.msra.mxu1 %v104_v16  ;;  %727 = vmatpush3.msra.mxu0 %v71_v17  ;;  %v117_v26 = vld [vmem:[#allocation2 + $0x1c8] sm:$0xff]  ;;  %v116_v30 = vld [vmem:[#allocation2 + $0x1c0] sm:$0xff]  ;;  %v67_v33 = vld [vmem:[#allocation2 + $0x38] sm:$0xff] }
  0x19   :  { %761 = vmatprep.subr.mxu1 %v119_v18  ;;  %728 = vmatprep.subr.mxu0 %v86_v19  ;;  %v101_v28 = vld [vmem:[#allocation2 + $0x148] sm:$0xff]  ;;  %v100_v32 = vld [vmem:[#allocation2 + $0x140] sm:$0xff]  ;;  %v115_v34 = vld [vmem:[#allocation2 + $0x1b8] sm:$0xff] }
  0x1a   :  { %762 = vmatpush3.msra.mxu1 %v103_v20  ;;  %729 = vmatpush3.msra.mxu0 %v70_v21  ;;  %v82_v35 = vld [vmem:[#allocation2 + $0xb0] sm:$0xff]  ;;  %v99_v36 = vld [vmem:[#allocation2 + $0x138] sm:$0xff]  ;;  %v81_v39 = vld [vmem:[#allocation2 + $0xa8] sm:$0xff] }
  0x1b   :  { %763 = vmatprep.subr.mxu1 %v118_v22  ;;  %730 = vmatprep.subr.mxu0 %v85_v23  ;;  %v66_v37 = vld [vmem:[#allocation2 + $0x30] sm:$0xff]  ;;  %v65_v41 = vld [vmem:[#allocation2 + $0x28] sm:$0xff]  ;;  %v80_v43 = vld [vmem:[#allocation2 + $0xa0] sm:$0xff] }
  0x1c   :  { %764 = vmatpush3.msra.mxu1 %v102_v24  ;;  %731 = vmatpush3.msra.mxu0 %v69_v25  ;;  %v114_v38 = vld [vmem:[#allocation2 + $0x1b0] sm:$0xff]  ;;  %v113_v42 = vld [vmem:[#allocation2 + $0x1a8] sm:$0xff]  ;;  %v64_v45 = vld [vmem:[#allocation2 + $0x20] sm:$0xff] }
  0x1d   :  { %765 = vmatprep.subr.mxu1 %v117_v26  ;;  %732 = vmatprep.subr.mxu0 %v84_v27  ;;  %v98_v40 = vld [vmem:[#allocation2 + $0x130] sm:$0xff]  ;;  %v97_v44 = vld [vmem:[#allocation2 + $0x128] sm:$0xff]  ;;  %v112_v46 = vld [vmem:[#allocation2 + $0x1a0] sm:$0xff] }
  0x1e   :  { %766 = vmatpush3.msra.mxu1 %v101_v28  ;;  %733 = vmatpush3.msra.mxu0 %v68_v29  ;;  %v79_v47 = vld [vmem:[#allocation2 + $0x98] sm:$0xff]  ;;  %v96_v48 = vld [vmem:[#allocation2 + $0x120] sm:$0xff]  ;;  %v78_v51 = vld [vmem:[#allocation2 + $0x90] sm:$0xff] }
  0x1f   :  { %767 = vmatprep.subr.mxu1 %v116_v30  ;;  %734 = vmatprep.subr.mxu0 %v83_v31  ;;  %v63_v49 = vld [vmem:[#allocation2 + $0x18] sm:$0xff]  ;;  %v62_v53 = vld [vmem:[#allocation2 + $0x10] sm:$0xff]  ;;  %v77_v55 = vld [vmem:[#allocation2 + $0x88] sm:$0xff] }
  0x20   :  { %768 = vmatpush3.msra.mxu1 %v100_v32  ;;  %735 = vmatpush3.msra.mxu0 %v67_v33  ;;  %v111_v50 = vld [vmem:[#allocation2 + $0x198] sm:$0xff]  ;;  %v110_v54 = vld [vmem:[#allocation2 + $0x190] sm:$0xff]  ;;  %v61_v57 = vld [vmem:[#allocation2 + $0x8] sm:$0xff] }
  0x21   :  { %769 = vmatprep.subr.mxu1 %v115_v34  ;;  %736 = vmatprep.subr.mxu0 %v82_v35  ;;  %v95_v52 = vld [vmem:[#allocation2 + $0x118] sm:$0xff]  ;;  %v94_v56 = vld [vmem:[#allocation2 + $0x110] sm:$0xff]  ;;  %v109_v58 = vld [vmem:[#allocation2 + $0x188] sm:$0xff] }
  0x22   :  { %770 = vmatpush3.msra.mxu1 %v99_v36  ;;  %737 = vmatpush3.msra.mxu0 %v66_v37  ;;  %v76_v59 = vld [vmem:[#allocation2 + $0x80] sm:$0xff]  ;;  %v54_v60 = vld [vmem:[%s1194_s0 + $0x8] sm:$0xff]  ;;  %v155_v1 = vld [vmem:[#allocation2 + $0x2f8] sm:$0xff] }
  0x23   :  { %771 = vmatprep.subr.mxu1 %v114_v38  ;;  %738 = vmatprep.subr.mxu0 %v81_v39  ;;  %v60_v61 = vld [vmem:[#allocation2] sm:$0xff]  ;;  %v93_v62 = vld [vmem:[#allocation2 + $0x108] sm:$0xff]  ;;  %v56_v3 = vld [vmem:[%s1194_s0 + $0x18] sm:$0xff] }
  0x24   :  { %772 = vmatpush3.msra.mxu1 %v98_v40  ;;  %739 = vmatpush3.msra.mxu0 %v65_v41  ;;  %v53_v63 = vld [vmem:[%s1194_s0] sm:$0xff]  ;;  %v139_v4 = vld [vmem:[#allocation2 + $0x278] sm:$0xff]  ;;  %v55_v5 = vld [vmem:[%s1194_s0 + $0x10] sm:$0xff] }
  0x25   :  { %773 = vmatprep.subr.mxu1 %v113_v42  ;;  %740 = vmatprep.subr.mxu0 %v80_v43  ;;  %v108_v0 = vld [vmem:[#allocation2 + $0x180] sm:$0xff]  ;;  %v154_v6 = vld [vmem:[#allocation2 + $0x2f0] sm:$0xff]  ;;  %v58_v8 = vld [vmem:[%s1194_s0 + $0x28] sm:$0xff] }
  0x26   :  { %774 = vmatpush3.msra.mxu1 %v97_v44  ;;  %741 = vmatpush3.msra.mxu0 %v64_v45  ;;  %v92_v2 = vld [vmem:[#allocation2 + $0x100] sm:$0xff]  ;;  %v138_v7 = vld [vmem:[#allocation2 + $0x270] sm:$0xff]  ;;  %v153_v9 = vld [vmem:[#allocation2 + $0x2e8] sm:$0xff] }
  0x27   :  { %775 = vmatprep.subr.mxu1 %v112_v46  ;;  %742 = vmatprep.subr.mxu0 %v79_v47  ;;  %v137_v10 = vld [vmem:[#allocation2 + $0x268] sm:$0xff]  ;;  %v152_v12 = vld [vmem:[#allocation2 + $0x2e0] sm:$0xff]  ;;  %v151_v16 = vld [vmem:[#allocation2 + $0x2d8] sm:$0xff] }
  0x28   :  { %776 = vmatpush3.msra.mxu1 %v96_v48  ;;  %743 = vmatpush3.msra.mxu0 %v63_v49  ;;  %v157_v11 = vld [vmem:[#allocation2 + $0x308] sm:$0xff]  ;;  %v136_v13 = vld [vmem:[#allocation2 + $0x260] sm:$0xff]  ;;  %v135_v17 = vld [vmem:[#allocation2 + $0x258] sm:$0xff] }
  0x29   :  { %777 = vmatprep.subr.mxu1 %v111_v50  ;;  %744 = vmatprep.subr.mxu0 %v78_v51  ;;  %v156_v15 = vld [vmem:[#allocation2 + $0x300] sm:$0xff]  ;;  %v59_v18 = vld [vmem:[%s1194_s0 + $0x30] sm:$0xff]  ;;  %v149_v21 = vld [vmem:[#allocation2 + $0x2c8] sm:$0xff] }
  0x2a   :  { %778 = vmatpush3.msra.mxu1 %v95_v52  ;;  %745 = vmatpush3.msra.mxu0 %v62_v53  ;;  %v150_v19 = vld [vmem:[#allocation2 + $0x2d0] sm:$0xff]  ;;  %v133_v22 = vld [vmem:[#allocation2 + $0x248] sm:$0xff]  ;;  %v148_v23 = vld [vmem:[#allocation2 + $0x2c0] sm:$0xff] }
  0x2b   :  { %779 = vmatprep.subr.mxu1 %v110_v54  ;;  %746 = vmatprep.subr.mxu0 %v77_v55  ;;  %v134_v20 = vld [vmem:[#allocation2 + $0x250] sm:$0xff]  ;;  %v132_v24 = vld [vmem:[#allocation2 + $0x240] sm:$0xff]  ;;  %v147_v25 = vld [vmem:[#allocation2 + $0x2b8] sm:$0xff] }
  0x2c   :  { %780 = vmatpush3.msra.mxu1 %v94_v56  ;;  %747 = vmatpush3.msra.mxu0 %v61_v57  ;;  %v131_v26 = vld [vmem:[#allocation2 + $0x238] sm:$0xff]  ;;  %v146_v27 = vld [vmem:[#allocation2 + $0x2b0] sm:$0xff]  ;;  %v145_v29 = vld [vmem:[#allocation2 + $0x2a8] sm:$0xff] }
  0x2d   :  { %781 = vmatprep.subr.mxu1 %v109_v58  ;;  %748 = vmatprep.subr.mxu0 %v76_v59  ;;  %v130_v28 = vld [vmem:[#allocation2 + $0x230] sm:$0xff]  ;;  %v129_v30 = vld [vmem:[#allocation2 + $0x228] sm:$0xff]  ;;  %v144_v31 = vld [vmem:[#allocation2 + $0x2a0] sm:$0xff] }
  0x2e   :  { %233 = vmatprep.mubr.f32.mxu0 %v54_v60  ;;  %749 = vmatpush3.msra.mxu0 %v60_v61  ;;  %v128_v32 = vld [vmem:[#allocation2 + $0x220] sm:$0xff]  ;;  %v143_v33 = vld [vmem:[#allocation2 + $0x298] sm:$0xff]  ;;  %v142_v35 = vld [vmem:[#allocation2 + $0x290] sm:$0xff] }
  0x2f   :  { %782 = vmatpush3.msra.mxu1 %v93_v62  ;;  %234 = vmatmul.mubr.f32.vlgmr.msra.gmra.mxu0 %v53_v63  ;;  %v127_v34 = vld [vmem:[#allocation2 + $0x218] sm:$0xff]  ;;  %v126_v36 = vld [vmem:[#allocation2 + $0x210] sm:$0xff]  ;;  %v141_v37 = vld [vmem:[#allocation2 + $0x288] sm:$0xff] }
  0x30   :  { %783 = vmatprep.subr.mxu1 %v108_v0  ;;  %788 = vmatprep.subr.mxu0 %v155_v1  ;;  %v125_v38 = vld [vmem:[#allocation2 + $0x208] sm:$0xff]  ;;  %v140_v39 = vld [vmem:[#allocation2 + $0x280] sm:$0xff]  ;;  %v494_v59 = vld [vmem:[%s1199_s5 + $0x78] sm:$0xff] }
  0x31   :  { %784 = vmatpush3.msra.mxu1 %v92_v2  ;;  %303 = vmatprep.mubr.f32.mxu1 %v56_v3  ;;  %v124_v40 = vld [vmem:[#allocation2 + $0x200] sm:$0xff]  ;;  %v493_v60 = vld [vmem:[%s1199_s5 + $0x70] sm:$0xff]  ;;  %v492_v61 = vld [vmem:[%s1199_s5 + $0x68] sm:$0xff] }
  0x32   :  { %789 = vmatpush3.msra.mxu0 %v139_v4  ;;  %304 = vmatmul.mubr.f32.vlgmr.msra.gmra.mxu1 %v55_v5  ;;  %v57_v41 = vld [vmem:[%s1194_s0 + $0x20] sm:$0xff]  ;;  %v490_v63 = vld [vmem:[%s1199_s5 + $0x58] sm:$0xff]  ;;  %v489_v0 = vld [vmem:[%s1199_s5 + $0x50] sm:$0xff] }
  0x33   :  { %790 = vmatprep.subr.mxu0 %v154_v6  ;;  %373 = vmatprep.mubr.f32.mxu0 %v58_v8  ;;  %v709_v49 = vld [vmem:[%s1196_s2] ss:$0 sm:$0xff]  ;;  %v488_v1 = vld [vmem:[%s1199_s5 + $0x48] sm:$0xff]  ;;  %v486_v3 = vld [vmem:[%s1199_s5 + $0x38] sm:$0xff] }
  0x34   :  { %791 = vmatpush3.msra.mxu0 %v138_v7  ;;  %852 = vmatprep.subr.mxu1 %v970_v14  ;;  %v491_v62 = vld [vmem:[%s1199_s5 + $0x60] sm:$0xff]  ;;  %v485_v4 = vld [vmem:[%s1199_s5 + $0x30] sm:$0xff]  ;;  %v484_v5 = vld [vmem:[%s1199_s5 + $0x28] sm:$0xff] }
  0x35   :  { %792 = vmatprep.subr.mxu0 %v153_v9  ;;  %853 = vmatpush3.msra.mxu1 %v157_v11  ;;  %v487_v2 = vld [vmem:[%s1199_s5 + $0x40] sm:$0xff]  ;;  %v482_v7 = vld [vmem:[%s1199_s5 + $0x18] sm:$0xff]  ;;  %v481_v8 = vld [vmem:[%s1199_s5 + $0x10] sm:$0xff] }
  0x36   :  { %793 = vmatpush3.msra.mxu0 %v137_v10  ;;  %854 = vmatprep.subr.mxu1 %v970_v14  ;;  %v483_v6 = vld [vmem:[%s1199_s5 + $0x20] sm:$0xff]  ;;  %v480_v9 = vld [vmem:[%s1199_s5 + $0x8] sm:$0xff] }
  0x37   :  { %794 = vmatprep.subr.mxu0 %v152_v12  ;;  %855 = vmatpush3.msra.mxu1 %v156_v15  ;;  %v479_v10 = vld [vmem:[%s1199_s5] sm:$0xff]  ;;  %s700_s5 = sshll.u32 %s972_s28, 4  ;;  %s701_s5 = int_to_ptr.vmem [resolvable:$true] %s700_s5 }
  0x38   :  { %795 = vmatpush3.msra.mxu0 %v136_v13  ;;  %856 = vmatprep.mubr.msk.f32.mxu1 %vm971_vm1, %v970_v14  ;;  %p948_p6 = scmp.lt.s32.totalorder %s701_s5, %s701_s5 }
  0x39   :  { %796 = vmatprep.subr.mxu0 %v151_v16  ;;  %857 = vmatmul.mubr.msk.f32.vlgmr.msra.gmra.mxu1 %vm165_vm0, %v59_v18 }
  0x3a   :  { %797 = vmatpush3.msra.mxu0 %v135_v17  ;;  %859 = vmatprep.subr.mxu1 %v970_v14 }
  0x3b   :  { %798 = vmatprep.subr.mxu0 %v150_v19  ;;  %891 = vmatprep.mubr.msk.f32.mxu1 %vm971_vm1, %v970_v14 }
  0x3c   :  { %799 = vmatpush3.msra.mxu0 %v134_v20  ;;  %860 = vmatpush3.msra.mxu1 %v494_v59 }
  0x3d   :  { %800 = vmatprep.subr.mxu0 %v149_v21  ;;  %861 = vmatprep.subr.mxu1 %v970_v14  ;;  %v711_v21 = vld [vmem:[%s1197_s3] ss:$0 sm:$0xff] }
  0x3e   :  { %801 = vmatpush3.msra.mxu0 %v133_v22  ;;  %862 = vmatpush3.msra.mxu1 %v493_v60 }
  0x3f   :  { %802 = vmatprep.subr.mxu0 %v148_v23  ;;  %863 = vmatprep.subr.mxu1 %v970_v14  ;;  %v712_v23 = vld [vmem:[%s1198_s4] ss:$0 sm:$0xff] }
  0x40   :  { %803 = vmatpush3.msra.mxu0 %v132_v24  ;;  %864 = vmatpush3.msra.mxu1 %v492_v61 }
  0x41   :  { %804 = vmatprep.subr.mxu0 %v147_v25  ;;  %865 = vmatprep.subr.mxu1 %v970_v14 }
  0x42   :  { %805 = vmatpush3.msra.mxu0 %v131_v26  ;;  %866 = vmatpush3.msra.mxu1 %v491_v62 }
  0x43   :  { %806 = vmatprep.subr.mxu0 %v146_v27  ;;  %867 = vmatprep.subr.mxu1 %v970_v14  ;;  %v713_v27 = vld [vmem:[%s1200_s6] ss:$0 sm:$0xff] }
  0x44   :  { %807 = vmatpush3.msra.mxu0 %v130_v28  ;;  %868 = vmatpush3.msra.mxu1 %v490_v63 }
  0x45   :  { %808 = vmatprep.subr.mxu0 %v145_v29  ;;  %869 = vmatprep.subr.mxu1 %v970_v14 }
  0x46   :  { %809 = vmatpush3.msra.mxu0 %v129_v30  ;;  %870 = vmatpush3.msra.mxu1 %v489_v0 }
  0x47   :  { %810 = vmatprep.subr.mxu0 %v144_v31  ;;  %871 = vmatprep.subr.mxu1 %v970_v14 }
  0x48   :  { %811 = vmatpush3.msra.mxu0 %v128_v32  ;;  %872 = vmatpush3.msra.mxu1 %v488_v1 }
  0x49   :  { %812 = vmatprep.subr.mxu0 %v143_v33  ;;  %873 = vmatprep.subr.mxu1 %v970_v14 }
  0x4a   :  { %813 = vmatpush3.msra.mxu0 %v127_v34  ;;  %874 = vmatpush3.msra.mxu1 %v487_v2  ;;  %v612_v34 = vld [vmem:[%s1203_s9 + $0x38] sm:$0xff] }
  0x4b   :  { %814 = vmatprep.subr.mxu0 %v142_v35  ;;  %875 = vmatprep.subr.mxu1 %v970_v14  ;;  %v611_v35 = vld [vmem:[%s1203_s9 + $0x30] sm:$0xff] }
  0x4c   :  { %815 = vmatpush3.msra.mxu0 %v126_v36  ;;  %876 = vmatpush3.msra.mxu1 %v486_v3  ;;  %v610_v36 = vld [vmem:[%s1203_s9 + $0x28] sm:$0xff] }
  0x4d   :  { %816 = vmatprep.subr.mxu0 %v141_v37  ;;  %877 = vmatprep.subr.mxu1 %v970_v14  ;;  %v609_v37 = vld [vmem:[%s1203_s9 + $0x20] sm:$0xff] }
  0x4e   :  { %817 = vmatpush3.msra.mxu0 %v125_v38  ;;  %878 = vmatpush3.msra.mxu1 %v485_v4  ;;  %v608_v38 = vld [vmem:[%s1203_s9 + $0x18] sm:$0xff] }
  0x4f   :  { %818 = vmatprep.subr.mxu0 %v140_v39  ;;  %879 = vmatprep.subr.mxu1 %v970_v14  ;;  %v607_v39 = vld [vmem:[%s1203_s9 + $0x10] sm:$0xff] }
  0x50   :  { %819 = vmatpush3.msra.mxu0 %v124_v40  ;;  %880 = vmatpush3.msra.mxu1 %v484_v5  ;;  %v606_v40 = vld [vmem:[%s1203_s9 + $0x8] sm:$0xff] }
  0x51   :  { %374 = vmatmul.mubr.f32.vlgmr.msra.gmra.mxu0 %v57_v41  ;;  %894 = vmatprep.subr.mxu0 %v970_v14  ;;  %v605_v41 = vld [vmem:[%s1203_s9] sm:$0xff] }
  0x52   :  { %910 = vmatprep.mubr.msk.f32.mxu0 %vm971_vm1, %v970_v14  ;;  %881 = vmatprep.subr.mxu1 %v970_v14 }
  0x53   :  { %882 = vmatpush3.msra.mxu1 %v483_v6  ;;  %895 = vmatpush3.msra.mxu0 %v612_v34 }
  0x54   :  { %883 = vmatprep.subr.mxu1 %v970_v14  ;;  %896 = vmatprep.subr.mxu0 %v970_v14 }
  0x55   :  { %884 = vmatpush3.msra.mxu1 %v482_v7  ;;  %897 = vmatpush3.msra.mxu0 %v611_v35 }
  0x56   :  { %885 = vmatprep.subr.mxu1 %v970_v14  ;;  %898 = vmatprep.subr.mxu0 %v970_v14 }
  0x57   :  { %886 = vmatpush3.msra.mxu1 %v481_v8  ;;  %899 = vmatpush3.msra.mxu0 %v610_v36 }
  0x58   :  { %887 = vmatprep.subr.mxu1 %v970_v14  ;;  %900 = vmatprep.subr.mxu0 %v970_v14 }
  0x59   :  { %888 = vmatpush3.msra.mxu1 %v480_v9  ;;  %901 = vmatpush3.msra.mxu0 %v609_v37 }
  0x5a   :  { %889 = vmatprep.subr.mxu1 %v970_v14  ;;  %902 = vmatprep.subr.mxu0 %v970_v14 }
  0x5b   :  { %890 = vmatpush3.msra.mxu1 %v479_v10  ;;  %903 = vmatpush3.msra.mxu0 %v608_v38 }
  0x5c   :  { %904 = vmatprep.subr.mxu0 %v970_v14 }
  0x5d   :  { %905 = vmatpush3.msra.mxu0 %v607_v39 }
  0x5e   :  { %906 = vmatprep.subr.mxu0 %v970_v14 }
  0x5f   :  { %907 = vmatpush3.msra.mxu0 %v606_v40 }
  0x60   :  { %908 = vmatprep.subr.mxu0 %v970_v14  ;;  %v715_v14 = vld [vmem:[%s1202_s8] ss:$0 sm:$0xff] }
  0x61   :  { %909 = vmatpush3.msra.mxu0 %v605_v41 }
  0xef   :  { %v750_v46 = vpop.f32.mrf.mxu0 }
  0xf1   :  { %v751_v47 = vpop.f32.mrf.mxu0 }
  0xf2   :  { %v785_v42 = vpop.f32.mrf.mxu1  ;;  %v752_v48 = vadd.f32 %v751_v47, %v750_v46 }
  0xf4   :  { %v786_v43 = vpop.f32.mrf.mxu1  ;;  %v236_v50 = vadd.f32 %v752_v48, %v709_v49 }
  0xf5   :  { %v787_v51 = vadd.f32 %v786_v43, %v785_v42 }
  0xf7   :  { %v306_v54 = vadd.f32 %v787_v51, %v236_v50  ;;  %v714_v51 = vld [vmem:[%s1201_s7] ss:$0 sm:$0xff]  ;;  %s943_s7 = scalar_lea.vmem %s701_s5, 128 }
  0xf8   :  { %p944_p5 = scmp.ne.s32.totalorder %s701_s5, %s943_s7  ;;  %p949_p7 = scmp.lt.s32.totalorder %s943_s7, %s943_s7 }
  0xf9   :  { %v445_v44 = vpop.f32.mrf.mxu1 }
  0xfa   :  { %p950_p8 = por %p949_p7, %p948_p6 }
  0xfb   :  { %v858_v45 = vpop.f32.mrf.mxu1 }
  0xfc   :  { %p951_p9 = pnand %p950_p8, %p944_p5 }
 0x111   :  { %v820_v52 = vpop.f32.mrf.mxu0 }
 0x113   :  { %v821_v53 = vpop.f32.mrf.mxu0 }
 0x114   :  { %v822_v55 = vadd.f32 %v821_v53, %v820_v52 }
 0x116   :  { %v376_v56 = vadd.f32 %v822_v55, %v306_v54 }
 0x118   :  { %v1070_v57 = vadd.f32 %v445_v44, %v376_v56  ;;  %v716_v56 = vld [vmem:[%s1204_s10] ss:$0 sm:$0xff] }
 0x11a   :  { %451 = vadd.xlane.f32.xlu0 %v1070_v57  ;;  %v454_v58 = vmul.f32 %v1070_v57, %v1070_v57 }
 0x11e   :  { %455 = vadd.xlane.f32.xlu0 %v454_v58 }
 0x1a3   :  { %v452_v11 = vpop.xlane.xlu0 %451 }
 0x1a4   :  { %v453_v12 = vmul.f32 0.0078125, %v452_v11 }
 0x1a6   :  { %v458_v15 = vmul.f32 %v453_v12, %v453_v12  ;;  %v460_v19 = vsub.f32 %v1070_v57, %v453_v12 }
 0x1a7   :  { %v456_v13 = vpop.xlane.xlu0 %455 }
 0x1a8   :  { %v457_v16 = vmul.f32 0.0078125, %v456_v13 }
 0x1aa   :  { %v459_v17 = vsub.f32 %v457_v16, %v458_v15 }
 0x1ac   :  { %v461_v18 = vadd.f32 1e-05, %v459_v17 }
 0x1ae   :  { %919 = vrsqrt.f32 %v461_v18 }
 0x1bb   :  { %v920_v20 = vpop.eup %919 }
 0x1bc   :  { %v463_v22 = vmul.f32 %v920_v20, %v460_v19 }
 0x1be   :  { %v470_v24 = vmul.f32 %v711_v21, %v463_v22 }
 0x1c0   :  { %v477_v25 = vadd.f32 %v712_v23, %v470_v24 }
 0x1c2   :  { %v478_v26 = vmax.f32 %v477_v25, 0.0 }
 0x1c4   :  { %892 = vmatmul.mubr.f32.vlgmr.msra.gmra.mxu1 %v478_v26 }
 0x284   :  { %v568_v28 = vpop.f32.mrf.mxu1 }
 0x285   :  { %v569_v29 = vadd.f32 %v713_v27, %v568_v28 }
 0x286   :  { %v893_v30 = vpop.f32.mrf.mxu1 }
 0x287   :  { %v575_v31 = vsel %vm574_vm2, %v569_v29, 0.0  ;;  %v579_v32 = vmul.f32 %v569_v29, %v569_v29 }
 0x288   :  { %576 = vadd.xlane.f32.xlu1 %v575_v31 }
 0x289   :  { %v580_v33 = vsel %vm574_vm2, %v579_v32, 0.0 }
 0x28c   :  { %581 = vadd.xlane.f32.xlu1 %v580_v33 }
 0x311   :  { %v577_v42 = vpop.xlane.xlu1 %576 }
 0x312   :  { %v578_v43 = vmul.f32 0.015625, %v577_v42 }
 0x314   :  { %v584_v45 = vmul.f32 %v578_v43, %v578_v43  ;;  %v586_v49 = vsub.f32 %v569_v29, %v578_v43 }
 0x315   :  { %v582_v44 = vpop.xlane.xlu1 %581 }
 0x316   :  { %v583_v46 = vmul.f32 0.015625, %v582_v44 }
 0x318   :  { %v585_v47 = vsub.f32 %v583_v46, %v584_v45 }
 0x31a   :  { %v587_v48 = vadd.f32 1e-05, %v585_v47 }
 0x31c   :  { %921 = vrsqrt.f32 %v587_v48 }
 0x329   :  { %v922_v50 = vpop.eup %921 }
 0x32a   :  { %v589_v52 = vmul.f32 %v922_v50, %v586_v49 }
 0x32c   :  { %v596_v53 = vmul.f32 %v714_v51, %v589_v52 }
 0x32e   :  { %v603_v54 = vadd.f32 %v715_v14, %v596_v53 }
 0x330   :  { %v604_v55 = vmax.f32 %v603_v54, 0.0 }
 0x332   :  { %911 = vmatmul.mubr.msk.f32.vlgmr.msra.gmra.mxu0 %vm574_vm2, %v604_v55 }
 0x3f2   :  { %v689_v57 = vpop.f32.mrf.mxu0 }
 0x3f3   :  { %v690_v58 = vadd.f32 %v716_v56, %v689_v57 }
 0x3f4   :  { %v912_v59 = vpop.f32.mrf.mxu0 }
 0x3f5   :  { %693 = vst [vmem:[#allocation5] sm:$0xff] %v690_v58 }
 0x3f6   :  { %954 = shalt.err (!%p951_p9)
}
 0x3f7   :  { %703 = dma.vmem_to_hbm [thread:$0]  %s701_s5, 128, %s1205_s11, [#allocation4]  }
 0x3f8   :  { %965 = dma.done.wait [#allocation4], 128  }
 0x3f9   :  { %966 = vsyncadd [#allocation4], 4294967168 }
 0x3fa   :  { %707 = vsyncpa [#allocation3], 1 }
 0x3fb   :  { %708 = vsyncpa [#allocation4], 1 }

</bundles_post_ra>
